<compile_context>
chip_gen: v7x
topology: tpu7x:2x2x1
jax: 0.10.0
libtpu: 0.0.40
codegen_flags: <defaults>
</compile_context>

<pallas_src>
import jax
import jax.numpy as jnp
from jax import lax
from jax.experimental import pallas as pl
from jax.experimental.pallas import tpu as pltpu

_MIB = 1024 * 1024
_INV_SQRT2 = 0.7071067811865476


def _round_up(x, m):
    return ((x + m - 1) // m) * m


def _gelu_exact(x):
    # F.gelu default = exact (erf-based) GELU, computed in f32.
    return 0.5 * x * (1.0 + lax.erf(x * _INV_SQRT2))


def mlp_kernel(x_ref, w1_ref, b1_ref, w2_ref, b2_ref, o_ref, acc_ref):
    # Grid: (i over row tiles [parallel], j over H chunks [arbitrary / reduction]).
    # x_ref : (tm, E)    row tile (any float dtype; cast to MXU dtype here)
    # w1_ref: (E, th)    c_fc weight chunk     b1_ref: (1, th) f32
    # w2_ref: (th, E)    c_proj weight chunk   b2_ref: (1, E)  f32
    # acc_ref: (tm, E) f32 accumulator scratch
    j = pl.program_id(1)

    @pl.when(j == 0)
    def _init():
        acc_ref[...] = jnp.zeros_like(acc_ref)

    x = x_ref[...].astype(w1_ref.dtype)
    h = jnp.dot(x, w1_ref[...], preferred_element_type=jnp.float32)
    h = _gelu_exact(h + b1_ref[...])                       # bias + GELU in f32
    acc_ref[...] += jnp.dot(h.astype(w2_ref.dtype), w2_ref[...],
                            preferred_element_type=jnp.float32)

    @pl.when(j == pl.num_programs(1) - 1)
    def _finalize():
        o_ref[...] = (acc_ref[...] + b2_ref[...]).astype(o_ref.dtype)


def _pick_tiles(M, E, H, x_bytes, w_bytes, o_bytes, tm, th):
    """Choose row tile tm, H-chunk th and the scoped-VMEM limit."""
    cap = 128 * _MIB
    try:
        cap = int(pltpu.get_tpu_info().vmem_capacity_bytes)
    except Exception:
        pass
    vmem_limit = int(min(100 * _MIB, max(32 * _MIB, cap - 16 * _MIB)))
    budget = int(0.8 * vmem_limit)

    if tm is None:
        # 512 rows on 128-MiB parts (v5e/v6e), 256 on v7x (64 MiB VMEM).
        tm = 512 if cap >= 96 * _MIB else 256
    tm = max(8, _round_up(min(tm, M), 8))

    def fits(th_):
        vmem = 0
        vmem += 2 * tm * E * x_bytes            # x tile, double-buffered
        vmem += 2 * tm * E * o_bytes            # out tile, double-buffered
        vmem += 2 * 2 * E * th_ * w_bytes       # W_fc + W_proj chunks (count 2 buffers each)
        vmem += 2 * 2 * (th_ + E) * 4           # biases
        vmem += tm * E * 4                      # f32 accumulator scratch
        vmem += 2 * tm * th_ * 4                # (tm, th) f32 intermediate headroom
        return vmem <= budget

    if th is None:
        if fits(H):
            th = H                              # weights fully resident, fetched once
        else:
            th = H
            for cand in (1024, 512, 256, 128):  # stream in lane-aligned chunks
                if cand < H and H % cand == 0 and fits(cand):
                    th = cand
                    break
    return tm, th, vmem_limit


def _mlp_forward(x, w_fc, b_fc, w_proj, b_proj, *, tm=None, th=None):
    """x: (B, S, E) -> (B, S, E).

    The weights' dtype is the MXU operand dtype: pass bf16 weights (cast once,
    outside the per-call path) for the fast path; f32 weights also work.
    """
    B, S, E = x.shape
    E2, H = w_fc.shape
    assert E2 == E and w_proj.shape == (H, E), "weight shapes must be (E,4E)/(4E,E)"
    M = B * S
    out_dtype = x.dtype
    w_dtype = w_fc.dtype

    x2d = x.reshape(M, E)
    b1 = b_fc.reshape(1, H).astype(jnp.float32)
    b2 = b_proj.reshape(1, E).astype(jnp.float32)

    tm, th, vmem_limit = _pick_tiles(
        M, E, H, x.dtype.itemsize, jnp.zeros((), w_dtype).dtype.itemsize,
        jnp.zeros((), out_dtype).dtype.itemsize, tm, th)
    assert H % th == 0, "H-chunk size must divide the hidden dim"

    n_i = pl.cdiv(M, tm)
    n_j = H // th
    w_bytes = jnp.zeros((), w_dtype).dtype.itemsize
    cost = pl.CostEstimate(
        flops=4 * M * E * H,                    # two matmuls, 2*M*E*H each
        transcendentals=M * H,                  # erf per hidden element
        bytes_accessed=int(M * E * (x.dtype.itemsize
                                    + jnp.zeros((), out_dtype).dtype.itemsize)
                           + (1 if th == H else n_i) * 2 * E * H * w_bytes
                           + (H + E) * 4),
    )

    out2d = pl.pallas_call(
        mlp_kernel,
        out_shape=jax.ShapeDtypeStruct((M, E), out_dtype),
        grid_spec=pltpu.PrefetchScalarGridSpec(
            num_scalar_prefetch=0,
            grid=(n_i, n_j),
            in_specs=[
                pl.BlockSpec((tm, E), lambda i, j: (i, 0)),   # x row tile
                pl.BlockSpec((E, th), lambda i, j: (0, j)),   # W_fc H-chunk
                pl.BlockSpec((1, th), lambda i, j: (0, j)),   # b_fc H-chunk
                pl.BlockSpec((th, E), lambda i, j: (j, 0)),   # W_proj H-chunk
                pl.BlockSpec((1, E), lambda i, j: (0, 0)),    # b_proj (resident)
            ],
            out_specs=pl.BlockSpec((tm, E), lambda i, j: (i, 0)),
            scratch_shapes=[pltpu.VMEM((tm, E), jnp.float32)],
        ),
        compiler_params=pltpu.CompilerParams(
            dimension_semantics=("parallel", "arbitrary"),
            vmem_limit_bytes=vmem_limit,
        ),
        cost_estimate=cost,
    )(x2d, w_fc, b1, w_proj, b2)

    return out2d.reshape(B, S, E)


mlp_forward = jax.jit(_mlp_forward, static_argnames=("tm", "th"))


def _reference(x, w_fc, b_fc, w_proj, b_proj):
    """Pure-JAX reference that mirrors the kernel's cast points exactly."""
    f32 = jnp.float32
    hp = lax.Precision.HIGHEST
    wdt = w_fc.dtype
    xq = x.astype(wdt).astype(f32)
    h = jnp.einsum("bse,eh->bsh", xq, w_fc.astype(f32), precision=hp)
    h = _gelu_exact(h + b_fc.astype(f32))
    hq = h.astype(wdt).astype(f32)
    y = jnp.einsum("bsh,he->bse", hq, w_proj.astype(f32), precision=hp)
    return (y + b_proj.astype(f32)).astype(x.dtype)


if __name__ == "__main__":
    # Small GPT-ish config (lane-dense): batch=2, seq=8, n_embed=128, hidden=512.
    B, S, E = 2, 8, 128
    H = 4 * E

    key = jax.random.PRNGKey(0)
    kx, k1, k2 = jax.random.split(key, 3)

    x = jax.random.normal(kx, (B, S, E), dtype=jnp.float32)
    w_fc_f32 = 0.02 * jax.random.normal(k1, (E, H), dtype=jnp.float32)
    b_fc = 0.01 * jnp.ones((H,), dtype=jnp.float32)
    w_proj_f32 = 0.02 * jax.random.normal(k2, (H, E), dtype=jnp.float32)
    b_proj = -0.01 * jnp.ones((E,), dtype=jnp.float32)

    # Default fast path: bf16 MXU operands; cast weights ONCE, outside the forward.
    w_fc = w_fc_f32.astype(jnp.bfloat16)
    w_proj = w_proj_f32.astype(jnp.bfloat16)

    out = jax.block_until_ready(mlp_forward(x, w_fc, b_fc, w_proj, b_proj))
    ref = _reference(x, w_fc, b_fc, w_proj, b_proj)
    assert out.shape == (B, S, E)
    assert jnp.allclose(out, ref, atol=1e-4, rtol=1e-2), "bf16 default path mismatch"

    # Ragged M (B*S = 21, not a multiple of the row tile): partial edge block, no pad.
    x2 = jax.random.normal(jax.random.PRNGKey(1), (3, 7, E), dtype=jnp.float32)
    out2 = jax.block_until_ready(mlp_forward(x2, w_fc, b_fc, w_proj, b_proj))
    ref2 = _reference(x2, w_fc, b_fc, w_proj, b_proj)
    assert jnp.allclose(out2, ref2, atol=1e-4, rtol=1e-2), "ragged-M mismatch"

    # Forced H-chunk streaming path (th < H): exercises the reduction grid axis,
    # pl.when init/finalize and the f32 VMEM accumulator.
    out3 = jax.block_until_ready(mlp_forward(x, w_fc, b_fc, w_proj, b_proj, th=128))
    assert jnp.allclose(out3, ref, atol=1e-4, rtol=1e-2), "H-chunk path mismatch"

    # Full-f32 weights path (no bf16 rounding of operands).
    out4 = jax.block_until_ready(mlp_forward(x, w_fc_f32, b_fc, w_proj_f32, b_proj))
    ref4 = _reference(x, w_fc_f32, b_fc, w_proj_f32, b_proj)
    assert jnp.allclose(out4, ref4, atol=2e-4, rtol=1e-2), "f32 path mismatch"

    print("KERNEL_OK")
</pallas_src>

<mosaic_0001>
module attributes {stable_mosaic.version = 11 : i64} {
  func.func @mlp_kernel(%arg0: i32, %arg1: i32, %arg2: memref<16x128xf32, #tpu.memory_space<vmem>>, %arg3: memref<128x512xbf16, #tpu.memory_space<vmem>>, %arg4: memref<1x512xf32, #tpu.memory_space<vmem>>, %arg5: memref<512x128xbf16, #tpu.memory_space<vmem>>, %arg6: memref<1x128xf32, #tpu.memory_space<vmem>>, %arg7: memref<16x128xf32, #tpu.memory_space<vmem>>, %arg8: memref<16x128xf32, #tpu.memory_space<vmem>>) attributes {dimension_semantics = [#tpu.dimension_semantics<parallel>, #tpu.dimension_semantics<arbitrary>], iteration_bounds = array<i64: 1, 1>, scalar_prefetch = 0 : i64, scratch_operands = 1 : i64, tpu.core_type = #tpu.core_type<tc>, window_params = [{transform_indices = @transform_0, window_bounds = array<i64: 16, 128>}, {transform_indices = @transform_1, window_bounds = array<i64: 128, 512>}, {transform_indices = @transform_2, window_bounds = array<i64: 1, 512>}, {transform_indices = @transform_3, window_bounds = array<i64: 512, 128>}, {pipeline_mode = #tpu.pipeline_mode<synchronous>, transform_indices = @transform_4, window_bounds = array<i64: 1, 128>}, {transform_indices = @transform_5, window_bounds = array<i64: 16, 128>}]} {
    %c0_i32 = arith.constant 0 : i32
    %0 = arith.cmpi eq, %arg1, %c0_i32 : i32
    %1 = arith.extui %0 : i1 to i32
    %c0_i32_0 = arith.constant 0 : i32
    %2 = arith.cmpi ne, %1, %c0_i32_0 : i32
    scf.if %2 {
      %cst_18 = arith.constant 0.000000e+00 : f32
      %27 = vector.broadcast %cst_18 : f32 to vector<16x128xf32>
      %c0_19 = arith.constant 0 : index
      %c0_20 = arith.constant 0 : index
      %28 = vector.load %arg8[%c0_19, %c0_20] : memref<16x128xf32, #tpu.memory_space<vmem>>, vector<16x128xf32>
      tpu.vector_store %arg8[%c0_19, %c0_20], %27 {strides = array<i32>} : memref<16x128xf32, #tpu.memory_space<vmem>>, vector<16x128xf32>,
    } else {
    }
    %c0 = arith.constant 0 : index
    %c0_1 = arith.constant 0 : index
    %3 = vector.load %arg2[%c0, %c0_1] : memref<16x128xf32, #tpu.memory_space<vmem>>, vector<16x128xf32>
    %4 = arith.truncf %3 : vector<16x128xf32> to vector<16x128xbf16>
    %c0_2 = arith.constant 0 : index
    %c0_3 = arith.constant 0 : index
    %5 = vector.load %arg3[%c0_2, %c0_3] : memref<128x512xbf16, #tpu.memory_space<vmem>>, vector<128x512xbf16>
    %cst = arith.constant dense<0.000000e+00> : vector<16x512xf32>
    %6 = tpu.matmul %4, %5, %cst {dimension_numbers = #tpu.dot_dimension_numbers<[1], [0], [0], [1], [0, 0, 1, 1], [], []>} : vector<16x128xbf16>, vector<128x512xbf16>, vector<16x512xf32> -> vector<16x512xf32>
    %c0_4 = arith.constant 0 : index
    %c0_5 = arith.constant 0 : index
    %7 = vector.load %arg4[%c0_4, %c0_5] : memref<1x512xf32, #tpu.memory_space<vmem>>, vector<1x512xf32>
    %8 = vector.broadcast %7 : vector<1x512xf32> to vector<16x512xf32>
    %9 = arith.addf %6, %8 : vector<16x512xf32>
    %cst_6 = arith.constant 5.000000e-01 : f32
    %10 = vector.broadcast %cst_6 : f32 to vector<16x512xf32>
    %11 = arith.mulf %10, %9 : vector<16x512xf32>
    %cst_7 = arith.constant 0.707106769 : f32
    %12 = vector.broadcast %cst_7 : f32 to vector<16x512xf32>
    %13 = arith.mulf %9, %12 : vector<16x512xf32>
    %14 = math.erf %13 : vector<16x512xf32>
    %cst_8 = arith.constant 1.000000e+00 : f32
    %15 = vector.broadcast %cst_8 : f32 to vector<16x512xf32>
    %16 = arith.addf %15, %14 : vector<16x512xf32>
    %17 = arith.mulf %11, %16 : vector<16x512xf32>
    %c0_9 = arith.constant 0 : index
    %c0_10 = arith.constant 0 : index
    %18 = vector.load %arg8[%c0_9, %c0_10] : memref<16x128xf32, #tpu.memory_space<vmem>>, vector<16x128xf32>
    %19 = arith.truncf %17 : vector<16x512xf32> to vector<16x512xbf16>
    %c0_11 = arith.constant 0 : index
    %c0_12 = arith.constant 0 : index
    %20 = vector.load %arg5[%c0_11, %c0_12] : memref<512x128xbf16, #tpu.memory_space<vmem>>, vector<512x128xbf16>
    %cst_13 = arith.constant dense<0.000000e+00> : vector<16x128xf32>
    %21 = tpu.matmul %19, %20, %cst_13 {dimension_numbers = #tpu.dot_dimension_numbers<[1], [0], [0], [1], [0, 0, 1, 1], [], []>} : vector<16x512xbf16>, vector<512x128xbf16>, vector<16x128xf32> -> vector<16x128xf32>
    %22 = arith.addf %18, %21 : vector<16x128xf32>
    %c0_14 = arith.constant 0 : index
    %c0_15 = arith.constant 0 : index
    %23 = vector.load %arg8[%c0_14, %c0_15] : memref<16x128xf32, #tpu.memory_space<vmem>>, vector<16x128xf32>
    tpu.vector_store %arg8[%c0_14, %c0_15], %22 {strides = array<i32>} : memref<16x128xf32, #tpu.memory_space<vmem>>, vector<16x128xf32>,
    %c0_i32_16 = arith.constant 0 : i32
    %24 = arith.cmpi eq, %arg1, %c0_i32_16 : i32
    %25 = arith.extui %24 : i1 to i32
    %c0_i32_17 = arith.constant 0 : i32
    %26 = arith.cmpi ne, %25, %c0_i32_17 : i32
    scf.if %26 {
      %c0_18 = arith.constant 0 : index
      %c0_19 = arith.constant 0 : index
      %27 = vector.load %arg8[%c0_18, %c0_19] : memref<16x128xf32, #tpu.memory_space<vmem>>, vector<16x128xf32>
      %c0_20 = arith.constant 0 : index
      %c0_21 = arith.constant 0 : index
      %28 = vector.load %arg6[%c0_20, %c0_21] : memref<1x128xf32, #tpu.memory_space<vmem>>, vector<1x128xf32>
      %29 = vector.broadcast %28 : vector<1x128xf32> to vector<16x128xf32>
      %30 = arith.addf %27, %29 : vector<16x128xf32>
      %c0_22 = arith.constant 0 : index
      %c0_23 = arith.constant 0 : index
      %31 = vector.load %arg7[%c0_22, %c0_23] : memref<16x128xf32, #tpu.memory_space<vmem>>, vector<16x128xf32>
      tpu.vector_store %arg7[%c0_22, %c0_23], %30 {strides = array<i32>} : memref<16x128xf32, #tpu.memory_space<vmem>>, vector<16x128xf32>,
    } else {
    }
    return
  }
  func.func @transform_0(%arg0: i32, %arg1: i32) -> (i32, i32) {
    %c0_i32 = arith.constant 0 : i32
    %c0_i32_0 = arith.constant 0 : i32
    return %arg0, %c0_i32 : i32, i32
  }
  func.func @transform_1(%arg0: i32, %arg1: i32) -> (i32, i32) {
    %c0_i32 = arith.constant 0 : i32
    %c0_i32_0 = arith.constant 0 : i32
    return %c0_i32, %arg1 : i32, i32
  }
  func.func @transform_2(%arg0: i32, %arg1: i32) -> (i32, i32) {
    %c0_i32 = arith.constant 0 : i32
    %c0_i32_0 = arith.constant 0 : i32
    return %c0_i32, %arg1 : i32, i32
  }
  func.func @transform_3(%arg0: i32, %arg1: i32) -> (i32, i32) {
    %c0_i32 = arith.constant 0 : i32
    %c0_i32_0 = arith.constant 0 : i32
    return %arg1, %c0_i32 : i32, i32
  }
  func.func @transform_4(%arg0: i32, %arg1: i32) -> (i32, i32) {
    %c0_i32 = arith.constant 0 : i32
    %c0_i32_0 = arith.constant 0 : i32
    %c0_i32_1 = arith.constant 0 : i32
    return %c0_i32, %c0_i32_0 : i32, i32
  }
  func.func @transform_5(%arg0: i32, %arg1: i32) -> (i32, i32) {
    %c0_i32 = arith.constant 0 : i32
    %c0_i32_0 = arith.constant 0 : i32
    return %arg0, %c0_i32 : i32, i32
  }
}

</mosaic_0001>

<bundles_post_ra>
// kernel: _mlp_forward.1
= control target key start
LH: loop header
LB: loop body
LE: loop exit
PB: predicated region body
PF: predicated region fallthrough
CT: control target
= control target key end

     0   :  { %10 = vsyncpa [#allocation4], 0  ;;  %s1297_s0 = inlined_call_operand.hbm [shape: f32[16,128], index: 0, kind: input, shape index: {}]   ;;  %s1298_s1 = inlined_call_operand.hbm [shape: bf16[128,512], index: 1, kind: input, shape index: {}]   ;;  %s1299_s2 = inlined_call_operand.hbm [shape: f32[1,512], index: 2, kind: input, shape index: {}]   ;;  %s1300_s3 = inlined_call_operand.hbm [shape: bf16[512,128], index: 3, kind: input, shape index: {}]   ;;  %s1301_s4 = inlined_call_operand.hbm [shape: f32[1,128], index: 4, kind: input, shape index: {}]   ;;  %s1302_s5 = inlined_call_operand.hbm [shape: f32[16,128], index: 5, kind: output, shape index: {}]  }
   0x1   :  { %11 = vsyncpa [#allocation7], 0 }
   0x2   :  { %12 = vsyncpa [#allocation10], 0 }
   0x3   :  { %13 = vsyncpa [#allocation5], 0  ;;  %s1176_s18 = smov [#allocation6]   ;;  %s1036_s22 = scalar_lea.hbm %s1298_s1, 4096 }
   0x4   :  { %s31_s19 = sshll.u32 %s1176_s18, 4  ;;  %p1037_p0 = scmp.ne.s32.totalorder %s1298_s1, %s1036_s22  ;;  %s32_s19 = int_to_ptr.vmem [resolvable:$true] %s31_s19 }
   0x5   :  { %p1040_p1 = scmp.lt.u32.totalorder %s1036_s22, %s1298_s1 }
   0x7   :  { %p1042_p2 = pnand %p1040_p1, %p1037_p0 }
   0x9   :  { %1045 = shalt.err (!%p1042_p2)
}
   0xa   :  { %s1046_s27 = scalar_lea.vmem %s32_s19, 4096  ;;  %p1051_p4 = scmp.lt.s32.totalorder %s32_s19, %s32_s19 }
   0xb   :  { %p1047_p3 = scmp.ne.s32.totalorder %s32_s19, %s1046_s27  ;;  %p1052_p5 = scmp.lt.s32.totalorder %s1046_s27, %s1046_s27 }
   0xd   :  { %p1053_p6 = por %p1052_p5, %p1051_p4 }
   0xf   :  { %p1054_p7 = pnand %p1053_p6, %p1047_p3 }
  0x11   :  { %1057 = shalt.err (!%p1054_p7)
}
  0x12   :  { %s1177_s28 = smov 256   ;;  %s1178_s29 = smov 16  }
  0x13   :  { %37 = dma.hbm_to_vmem [thread:$0]  %s1298_s1, 4096, %s32_s19, [#allocation7], %s1177_s28, %s1177_s28, %s1178_s29  }
  0x14   :  { %s1179_s7 = smov [#allocation9]   ;;  %s1058_s11 = scalar_lea.hbm %s1300_s3, 4096 }
  0x15   :  { %s53_s8 = sshll.u32 %s1179_s7, 4  ;;  %p1059_p8 = scmp.ne.s32.totalorder %s1300_s3, %s1058_s11  ;;  %s54_s8 = int_to_ptr.vmem [resolvable:$true] %s53_s8 }
  0x16   :  { %p1062_p9 = scmp.lt.u32.totalorder %s1058_s11, %s1300_s3 }
  0x18   :  { %p1064_p10 = pnand %p1062_p9, %p1059_p8 }
  0x1a   :  { %1067 = shalt.err (!%p1064_p10)
}
  0x1b   :  { %s1068_s16 = scalar_lea.vmem %s54_s8, 4096  ;;  %p1073_p12 = scmp.lt.s32.totalorder %s54_s8, %s54_s8 }
  0x1c   :  { %p1069_p11 = scmp.ne.s32.totalorder %s54_s8, %s1068_s16  ;;  %p1074_p13 = scmp.lt.s32.totalorder %s1068_s16, %s1068_s16 }
  0x1e   :  { %p1075_p0 = por %p1074_p13, %p1073_p12 }
  0x20   :  { %p1076_p1 = pnand %p1075_p0, %p1069_p11 }
  0x22   :  { %1079 = shalt.err (!%p1076_p1)
}
  0x23   :  { %s1180_s1 = smov 64   ;;  %s1181_s17 = smov 4  }
  0x24   :  { %59 = dma.hbm_to_vmem [thread:$0]  %s1300_s3, 4096, %s54_s8, [#allocation10], %s1180_s1, %s1180_s1, %s1181_s17  }
  0x25   :  { %s1182_s20 = smov [#allocation3]   ;;  %s1080_s24 = scalar_lea.hbm %s1297_s0, 256 }
  0x26   :  { %s19_s21 = sshll.u32 %s1182_s20, 4  ;;  %p1081_p2 = scmp.ne.s32.totalorder %s1297_s0, %s1080_s24  ;;  %s20_s21 = int_to_ptr.vmem [resolvable:$true] %s19_s21 }
  0x27   :  { %p1084_p3 = scmp.lt.u32.totalorder %s1080_s24, %s1297_s0 }
  0x29   :  { %p1086_p4 = pnand %p1084_p3, %p1081_p2 }
  0x2b   :  { %1089 = shalt.err (!%p1086_p4)
}
  0x2c   :  { %s1090_s29 = scalar_lea.vmem %s20_s21, 256  ;;  %p1095_p6 = scmp.lt.s32.totalorder %s20_s21, %s20_s21 }
  0x2d   :  { %p1091_p5 = scmp.ne.s32.totalorder %s20_s21, %s1090_s29  ;;  %p1096_p7 = scmp.lt.s32.totalorder %s1090_s29, %s1090_s29 }
  0x2f   :  { %p1097_p8 = por %p1096_p7, %p1095_p6 }
  0x31   :  { %p1098_p9 = pnand %p1097_p8, %p1091_p5 }
  0x33   :  { %1101 = shalt.err (!%p1098_p9)
}
  0x34   :  { %s1183_s3 = smov 128   ;;  %s1184_s30 = smov 8  }
  0x35   :  { %25 = dma.hbm_to_vmem [thread:$0]  %s1297_s0, 256, %s20_s21, [#allocation4], %s1183_s3, %s1183_s3, %s1184_s30  }
  0x36   :  { %s1185_s8 = smov [#allocation8]   ;;  %s1186_s10 = smov [#allocation11]  }
  0x37   :  { %s44_s9 = sshll.u32 %s1185_s8, 4  ;;  %s66_s11 = sshll.u32 %s1186_s10, 4  ;;  %s45_s9 = int_to_ptr.vmem [resolvable:$true] %s44_s9  ;;  %s67_s11 = int_to_ptr.vmem [resolvable:$true] %s66_s11 }
  0x38   :  { %s1102_s14 = scalar_lea.hbm %s1299_s2, 64 }
  0x39   :  { %p1103_p10 = scmp.ne.s32.totalorder %s1299_s2, %s1102_s14  ;;  %p1106_p11 = scmp.lt.u32.totalorder %s1102_s14, %s1299_s2 }
  0x3b   :  { %p1108_p12 = pnand %p1106_p11, %p1103_p10 }
  0x3d   :  { %1111 = shalt.err (!%p1108_p12)
}
  0x3e   :  { %s1112_s0 = scalar_lea.vmem %s45_s9, 64  ;;  %p1117_p0 = scmp.lt.s32.totalorder %s45_s9, %s45_s9 }
  0x3f   :  { %p1113_p13 = scmp.ne.s32.totalorder %s45_s9, %s1112_s0  ;;  %p1118_p1 = scmp.lt.s32.totalorder %s1112_s0, %s1112_s0 }
  0x41   :  { %p1119_p2 = por %p1118_p1, %p1117_p0 }
  0x43   :  { %p1120_p3 = pnand %p1119_p2, %p1113_p13 }
  0x45   :  { %1123 = shalt.err (!%p1120_p3)
}
  0x46   :  { %47 = dma.hbm_to_vmem [thread:$0]  %s1299_s2, 64, %s45_s9, [#allocation7]  }
  0x47   :  { %s1124_s22 = scalar_lea.hbm %s1301_s4, 16 }
  0x48   :  { %p1125_p4 = scmp.ne.s32.totalorder %s1301_s4, %s1124_s22  ;;  %p1128_p5 = scmp.lt.u32.totalorder %s1124_s22, %s1301_s4 }
  0x4a   :  { %p1130_p6 = pnand %p1128_p5, %p1125_p4 }
  0x4c   :  { %1133 = shalt.err (!%p1130_p6)
}
  0x4d   :  { %s1134_s27 = scalar_lea.vmem %s67_s11, 16  ;;  %s1138_s28 = scalar_lea.vmem %s67_s11, 32 }
  0x4e   :  { %p1135_p7 = scmp.ne.s32.totalorder %s67_s11, %s1134_s27  ;;  %p1139_p8 = scmp.lt.s32.totalorder %s67_s11, %s67_s11 }
  0x4f   :  { %p1140_p9 = scmp.lt.s32.totalorder %s1138_s28, %s1134_s27 }
  0x51   :  { %p1141_p10 = por %p1140_p9, %p1139_p8 }
  0x53   :  { %p1142_p11 = pnand %p1141_p10, %p1135_p7 }
  0x55   :  { %1145 = shalt.err (!%p1142_p11)
}
  0x56   :  { %69 = dma.hbm_to_vmem [thread:$0]  %s1301_s4, 16, %s67_s11, [#allocation10]  }
  0x57   :  { %1168 = dma.done.wait [#allocation4], 256  }
  0x58   :  { %1169 = vsyncadd [#allocation4], 4294967040 }
  0x59   :  { %1170 = dma.done.wait [#allocation7], 4160  }
  0x5a   :  { %1171 = vsyncadd [#allocation7], 4294963136 }
  0x5b   :  { %1172 = dma.done.wait [#allocation10], 4112  }
  0x5c   :  { %1173 = vsyncadd [#allocation10], 4294963184  ;;  %v1187_v0 = vmov 0   ;;  %v940_v1 = vld [vmem:[#allocation6 + $0x4] ss:$16 sps:$4 sm:$0xff]   ;;  %v93_v34 = vld [vmem:[#allocation3 + $0x8] sm:$0xff] }
  0x5d   :  { %341 = vmatprep.mubr.bf16.mxu0 %v1187_v0  ;;  %384 = vmatprep.mubr.bf16.mxu1 %v1187_v0  ;;  %v942_v2 = vld [vmem:[#allocation6 + $0xc] ss:$16 sps:$4 sm:$0xff]   ;;  %v944_v3 = vld [vmem:[#allocation6] ss:$16 sps:$4 sm:$0xff]   ;;  %v945_v4 = vld [vmem:[#allocation6 + $0x8] ss:$16 sps:$4 sm:$0xff]  }
  0x5e   :  { %309 = vmatprep.subr.bf16.mxu0 %v940_v1  ;;  %352 = vmatprep.subr.bf16.mxu1 %v942_v2  ;;  %v946_v5 = vld [vmem:[#allocation6 + $0x24] ss:$16 sps:$4 sm:$0xff]   ;;  %v948_v6 = vld [vmem:[#allocation6 + $0x2c] ss:$16 sps:$4 sm:$0xff]   ;;  %v950_v7 = vld [vmem:[#allocation6 + $0x20] ss:$16 sps:$4 sm:$0xff]  }
  0x5f   :  { %310 = vmatpush1.bf16.msra.mxu0 %v944_v3  ;;  %353 = vmatpush1.bf16.msra.mxu1 %v945_v4  ;;  %v951_v8 = vld [vmem:[#allocation6 + $0x28] ss:$16 sps:$4 sm:$0xff]   ;;  %v952_v9 = vld [vmem:[#allocation6 + $0x44] ss:$16 sps:$4 sm:$0xff]   ;;  %v954_v10 = vld [vmem:[#allocation6 + $0x4c] ss:$16 sps:$4 sm:$0xff]   ;;  %v129_v4 = vlaneseq }
  0x60   :  { %311 = vmatprep.subr.bf16.mxu0 %v946_v5  ;;  %354 = vmatprep.subr.bf16.mxu1 %v948_v6  ;;  %v956_v11 = vld [vmem:[#allocation6 + $0x40] ss:$16 sps:$4 sm:$0xff]   ;;  %v957_v12 = vld [vmem:[#allocation6 + $0x48] ss:$16 sps:$4 sm:$0xff]   ;;  %v958_v13 = vld [vmem:[#allocation6 + $0x64] ss:$16 sps:$4 sm:$0xff]  }
  0x61   :  { %v960_v14 = vld [vmem:[#allocation6 + $0x6c] ss:$16 sps:$4 sm:$0xff]   ;;  %v962_v15 = vld [vmem:[#allocation6 + $0x60] ss:$16 sps:$4 sm:$0xff]   ;;  %v963_v16 = vld [vmem:[#allocation6 + $0x68] ss:$16 sps:$4 sm:$0xff]  }
  0x62   :  { %v964_v17 = vld [vmem:[#allocation6 + $0x84] ss:$16 sps:$4 sm:$0xff]   ;;  %v966_v18 = vld [vmem:[#allocation6 + $0x8c] ss:$16 sps:$4 sm:$0xff]   ;;  %v968_v19 = vld [vmem:[#allocation6 + $0x80] ss:$16 sps:$4 sm:$0xff]  }
  0x63   :  { %312 = vmatpush1.bf16.msra.mxu0 %v950_v7  ;;  %355 = vmatpush1.bf16.msra.mxu1 %v951_v8  ;;  %v969_v20 = vld [vmem:[#allocation6 + $0x88] ss:$16 sps:$4 sm:$0xff]   ;;  %v970_v21 = vld [vmem:[#allocation6 + $0xa4] ss:$16 sps:$4 sm:$0xff]   ;;  %v972_v22 = vld [vmem:[#allocation6 + $0xac] ss:$16 sps:$4 sm:$0xff]  }
  0x64   :  { %313 = vmatprep.subr.bf16.mxu0 %v952_v9  ;;  %356 = vmatprep.subr.bf16.mxu1 %v954_v10  ;;  %v974_v23 = vld [vmem:[#allocation6 + $0xa0] ss:$16 sps:$4 sm:$0xff]   ;;  %v975_v24 = vld [vmem:[#allocation6 + $0xa8] ss:$16 sps:$4 sm:$0xff]   ;;  %v976_v25 = vld [vmem:[#allocation6 + $0xc4] ss:$16 sps:$4 sm:$0xff]  }
  0x65   :  { %v978_v26 = vld [vmem:[#allocation6 + $0xcc] ss:$16 sps:$4 sm:$0xff]   ;;  %v980_v27 = vld [vmem:[#allocation6 + $0xc0] ss:$16 sps:$4 sm:$0xff]   ;;  %v981_v28 = vld [vmem:[#allocation6 + $0xc8] ss:$16 sps:$4 sm:$0xff]  }
  0x66   :  { %v982_v29 = vld [vmem:[#allocation6 + $0xe4] ss:$16 sps:$4 sm:$0xff]   ;;  %v984_v30 = vld [vmem:[#allocation6 + $0xec] ss:$16 sps:$4 sm:$0xff]   ;;  %v986_v31 = vld [vmem:[#allocation6 + $0xe0] ss:$16 sps:$4 sm:$0xff]  }
  0x67   :  { %314 = vmatpush1.bf16.msra.mxu0 %v956_v11  ;;  %357 = vmatpush1.bf16.msra.mxu1 %v957_v12  ;;  %v987_v32 = vld [vmem:[#allocation6 + $0xe8] ss:$16 sps:$4 sm:$0xff]   ;;  %v92_v33 = vld [vmem:[#allocation3] sm:$0xff]  ;;  %v1000_v48 = vld [vmem:[#allocation9 + $0x58] sm:$0xff]   ;;  %v130_v5 = vshrl.u32 %v129_v4, 7  ;;  %s1188_s4 = smov [#allocation12]  }
  0x68   :  { %315 = vmatprep.subr.bf16.mxu0 %v958_v13  ;;  %358 = vmatprep.subr.bf16.mxu1 %v960_v14  ;;  %v988_v35 = vld [vmem:[#allocation9 + $0x40] sm:$0xff]   ;;  %v94_v39 = vpack.c.bf16 %v93_v34, %v92_v33  ;;  %v992_v40 = vld [vmem:[#allocation9 + $0x48] sm:$0xff]   ;;  %v996_v44 = vld [vmem:[#allocation9 + $0x50] sm:$0xff]   ;;  %s804_s6 = sshll.u32 %s1188_s4, 4  ;;  %s805_s6 = int_to_ptr.vmem [resolvable:$true] %s804_s6 }
  0x69   :  { %v989_v36 = vld [vmem:[#allocation9 + $0xc0] sm:$0xff]   ;;  %v993_v41 = vld [vmem:[#allocation9 + $0xc8] sm:$0xff]   ;;  %v997_v45 = vld [vmem:[#allocation9 + $0xd0] sm:$0xff]   ;;  %v131_v6 = vsub.s32 0, %v130_v5  ;;  %v139_v7 = vsub.s32 2, %v130_v5  ;;  %v135_v9 = vsub.s32 1, %v130_v5  ;;  %p1151_p13 = scmp.lt.s32.totalorder %s805_s6, %s805_s6 }
  0x6a   :  { %v990_v37 = vld [vmem:[#allocation9] sm:$0xff]   ;;  %v994_v42 = vld [vmem:[#allocation9 + $0x8] sm:$0xff]   ;;  %v998_v46 = vld [vmem:[#allocation9 + $0x10] sm:$0xff]   ;;  %v143_v10 = vsub.s32 3, %v130_v5  ;;  %s1146_s7 = scalar_lea.vmem %s805_s6, 256 }
  0x6b   :  { %316 = vmatpush1.bf16.msra.mxu0 %v962_v15  ;;  %359 = vmatpush1.bf16.msra.mxu1 %v963_v16  ;;  %v991_v38 = vld [vmem:[#allocation9 + $0x80] sm:$0xff]   ;;  %v995_v43 = vld [vmem:[#allocation9 + $0x88] sm:$0xff]   ;;  %v999_v47 = vld [vmem:[#allocation9 + $0x90] sm:$0xff]   ;;  %p1147_p12 = scmp.ne.s32.totalorder %s805_s6, %s1146_s7  ;;  %p1152_p0 = scmp.lt.s32.totalorder %s1146_s7, %s1146_s7 }
  0x6c   :  { %317 = vmatprep.subr.bf16.mxu0 %v964_v17  ;;  %360 = vmatprep.subr.bf16.mxu1 %v966_v18  ;;  %v1001_v49 = vld [vmem:[#allocation9 + $0xd8] sm:$0xff]   ;;  %v1004_v52 = vld [vmem:[#allocation9 + $0x60] sm:$0xff]   ;;  %v1008_v56 = vld [vmem:[#allocation9 + $0x68] sm:$0xff]  }
  0x6d   :  { %v1002_v50 = vld [vmem:[#allocation9 + $0x18] sm:$0xff]   ;;  %v1005_v53 = vld [vmem:[#allocation9 + $0xe0] sm:$0xff]   ;;  %v1009_v57 = vld [vmem:[#allocation9 + $0xe8] sm:$0xff]   ;;  %p1153_p1 = por %p1152_p0, %p1151_p13 }
  0x6e   :  { %v1003_v51 = vld [vmem:[#allocation9 + $0x98] sm:$0xff]   ;;  %v1006_v54 = vld [vmem:[#allocation9 + $0x20] sm:$0xff]   ;;  %v1010_v58 = vld [vmem:[#allocation9 + $0x28] sm:$0xff]  }
  0x6f   :  { %318 = vmatpush1.bf16.msra.mxu0 %v968_v19  ;;  %361 = vmatpush1.bf16.msra.mxu1 %v969_v20  ;;  %v1007_v55 = vld [vmem:[#allocation9 + $0xa0] sm:$0xff]   ;;  %v1011_v59 = vld [vmem:[#allocation9 + $0xa8] sm:$0xff]   ;;  %v1012_v60 = vld [vmem:[#allocation9 + $0x70] sm:$0xff]   ;;  %p1154_p2 = pnand %p1153_p1, %p1147_p12 }
  0x70   :  { %319 = vmatprep.subr.bf16.mxu0 %v970_v21  ;;  %362 = vmatprep.subr.bf16.mxu1 %v972_v22  ;;  %v1013_v61 = vld [vmem:[#allocation9 + $0xf0] sm:$0xff]   ;;  %v1016_v0 = vld [vmem:[#allocation9 + $0x78] sm:$0xff]  }
  0x71   :  { %v1014_v62 = vld [vmem:[#allocation9 + $0x30] sm:$0xff]   ;;  %v1017_v1 = vld [vmem:[#allocation9 + $0xf8] sm:$0xff]  }
  0x72   :  { %v1015_v63 = vld [vmem:[#allocation9 + $0xb0] sm:$0xff]   ;;  %v1018_v2 = vld [vmem:[#allocation9 + $0x38] sm:$0xff]  }
  0x73   :  { %320 = vmatpush1.bf16.msra.mxu0 %v974_v23  ;;  %363 = vmatpush1.bf16.msra.mxu1 %v975_v24  ;;  %v1019_v3 = vld [vmem:[#allocation9 + $0xb8] sm:$0xff]  }
  0x74   :  { %321 = vmatprep.subr.bf16.mxu0 %v976_v25  ;;  %364 = vmatprep.subr.bf16.mxu1 %v978_v26  ;;  %v127_v8 = vld [vmem:[#allocation8] sm:$0xf] }
  0x75   :  { %v132_v11 = vrot.slane %v127_v8, %v131_v6  ;;  %v140_v12 = vrot.slane %v127_v8, %v139_v7  ;;  %v136_v13 = vrot.slane %v127_v8, %v135_v9  ;;  %v144_v14 = vrot.slane %v127_v8, %v143_v10 }
  0x77   :  { %322 = vmatpush1.bf16.msra.mxu0 %v980_v27  ;;  %365 = vmatpush1.bf16.msra.mxu1 %v981_v28 }
  0x78   :  { %323 = vmatprep.subr.bf16.mxu0 %v982_v29  ;;  %366 = vmatprep.subr.bf16.mxu1 %v984_v30 }
  0x7b   :  { %324 = vmatpush1.bf16.msra.mxu0 %v986_v31  ;;  %367 = vmatpush1.bf16.msra.mxu1 %v987_v32 }
  0x7c   :  { %883 = vmatprep.subr.bf16.mxu0 %v988_v35  ;;  %905 = vmatprep.subr.bf16.mxu1 %v989_v36 }
  0x7e   :  { %342 = vmatmul.mubr.bf16.vlgmr.msra.gmra.mrb[0].mxu0 %v94_v39  ;;  %385 = vmatmul.mubr.bf16.vlgmr.msra.gmra.mrb[0].mxu1 %v94_v39 }
  0x7f   :  { %884 = vmatpush3.bf16.msra.mxu0 %v990_v37  ;;  %906 = vmatpush3.bf16.msra.mxu1 %v991_v38 }
  0x80   :  { %885 = vmatprep.subr.bf16.mxu0 %v992_v40  ;;  %907 = vmatprep.subr.bf16.mxu1 %v993_v41 }
  0x83   :  { %886 = vmatpush3.bf16.msra.mxu0 %v994_v42  ;;  %908 = vmatpush3.bf16.msra.mxu1 %v995_v43 }
  0x84   :  { %887 = vmatprep.subr.bf16.mxu0 %v996_v44  ;;  %909 = vmatprep.subr.bf16.mxu1 %v997_v45 }
  0x87   :  { %888 = vmatpush3.bf16.msra.mxu0 %v998_v46  ;;  %910 = vmatpush3.bf16.msra.mxu1 %v999_v47 }
  0x88   :  { %889 = vmatprep.subr.bf16.mxu0 %v1000_v48  ;;  %911 = vmatprep.subr.bf16.mxu1 %v1001_v49 }
  0x8b   :  { %890 = vmatpush3.bf16.msra.mxu0 %v1002_v50  ;;  %912 = vmatpush3.bf16.msra.mxu1 %v1003_v51 }
  0x8c   :  { %891 = vmatprep.subr.bf16.mxu0 %v1004_v52  ;;  %913 = vmatprep.subr.bf16.mxu1 %v1005_v53 }
  0x8f   :  { %892 = vmatpush3.bf16.msra.mxu0 %v1006_v54  ;;  %914 = vmatpush3.bf16.msra.mxu1 %v1007_v55 }
  0x90   :  { %893 = vmatprep.subr.bf16.mxu0 %v1008_v56  ;;  %915 = vmatprep.subr.bf16.mxu1 %v1009_v57 }
  0x93   :  { %894 = vmatpush3.bf16.msra.mxu0 %v1010_v58  ;;  %916 = vmatpush3.bf16.msra.mxu1 %v1011_v59 }
  0x94   :  { %895 = vmatprep.subr.bf16.mxu0 %v1012_v60  ;;  %917 = vmatprep.subr.bf16.mxu1 %v1013_v61 }
  0x97   :  { %896 = vmatpush3.bf16.msra.mxu0 %v1014_v62  ;;  %918 = vmatpush3.bf16.msra.mxu1 %v1015_v63 }
  0x98   :  { %897 = vmatprep.subr.bf16.mxu0 %v1016_v0  ;;  %919 = vmatprep.subr.bf16.mxu1 %v1017_v1 }
  0x9b   :  { %898 = vmatpush3.bf16.msra.mxu0 %v1018_v2  ;;  %920 = vmatpush3.bf16.msra.mxu1 %v1019_v3 }
 0x151   :  { %v343_v15 = vpop.f32.mrb[0].mxu0  ;;  %v386_v16 = vpop.f32.mrb[0].mxu1 }
 0x152   :  { %v344_v17 = vadd.f32 %v343_v15, %v132_v11  ;;  %v387_v18 = vadd.f32 %v386_v16, %v140_v12  ;;  %v345_v19 = vpop.f32.mrb[1].mxu0  ;;  %v388_v20 = vpop.f32.mrb[1].mxu1 }
 0x153   :  { %v346_v21 = vadd.f32 %v345_v19, %v136_v13  ;;  %v389_v22 = vadd.f32 %v388_v20, %v144_v14  ;;  %v347_v23 = vpop.f32.mrb[2].mxu0  ;;  %v390_v24 = vpop.f32.mrb[2].mxu1  ;;  %v882_v20 = vld [vmem:[#allocation11] ss:$0 sm:$0xff] }
 0x154   :  { %v403_v25 = vmul.f32 0.70710677, %v344_v17  ;;  %v405_v26 = vmul.f32 0.70710677, %v387_v18  ;;  %v348_v29 = vadd.f32 %v347_v23, %v132_v11  ;;  %v391_v30 = vadd.f32 %v390_v24, %v140_v12  ;;  %v349_v31 = vpop.f32.mrb[3].mxu0  ;;  %v392_v32 = vpop.f32.mrb[3].mxu1 }
 0x155   :  { %v404_v27 = vmul.f32 0.70710677, %v346_v21  ;;  %v406_v28 = vmul.f32 0.70710677, %v389_v22  ;;  %v350_v33 = vadd.f32 %v349_v31, %v136_v13  ;;  %v393_v34 = vadd.f32 %v392_v32, %v144_v14 }
 0x156   :  { %1020 = verf.f32 %v403_v25  ;;  %v407_v35 = vmul.f32 0.70710677, %v348_v29  ;;  %v409_v36 = vmul.f32 0.70710677, %v391_v30  ;;  %v395_v45 = vmul.f32 0.5, %v344_v17 }
 0x157   :  { %1022 = verf.f32 %v405_v26  ;;  %v408_v37 = vmul.f32 0.70710677, %v350_v33  ;;  %v410_v38 = vmul.f32 0.70710677, %v393_v34  ;;  %v397_v46 = vmul.f32 0.5, %v387_v18 }
 0x158   :  { %1024 = verf.f32 %v404_v27  ;;  %v396_v49 = vmul.f32 0.5, %v346_v21  ;;  %v399_v51 = vmul.f32 0.5, %v348_v29  ;;  %v398_v54 = vmul.f32 0.5, %v389_v22 }
 0x159   :  { %1026 = verf.f32 %v406_v28  ;;  %v401_v56 = vmul.f32 0.5, %v391_v30  ;;  %v400_v61 = vmul.f32 0.5, %v350_v33  ;;  %v402_v1 = vmul.f32 0.5, %v393_v34 }
 0x15a   :  { %1028 = verf.f32 %v407_v35 }
 0x15b   :  { %1030 = verf.f32 %v409_v36 }
 0x15c   :  { %1032 = verf.f32 %v408_v37 }
 0x15d   :  { %1034 = verf.f32 %v410_v38 }
 0x160   :  { %v1021_v39 = vpop.eup %1020 }
 0x161   :  { %v1023_v40 = vpop.eup %1022  ;;  %v419_v43 = vadd.f32 1.0, %v1021_v39 }
 0x162   :  { %v1025_v41 = vpop.eup %1024  ;;  %v421_v47 = vadd.f32 1.0, %v1023_v40 }
 0x163   :  { %v1027_v42 = vpop.eup %1026  ;;  %v420_v50 = vadd.f32 1.0, %v1025_v41  ;;  %v427_v59 = vmul.f32 %v419_v43, %v395_v45 }
 0x164   :  { %v1029_v44 = vpop.eup %1028  ;;  %v422_v55 = vadd.f32 1.0, %v1027_v42  ;;  %v429_v63 = vmul.f32 %v421_v47, %v397_v46 }
 0x165   :  { %v1031_v48 = vpop.eup %1030  ;;  %v423_v52 = vadd.f32 1.0, %v1029_v44  ;;  %v428_v3 = vmul.f32 %v420_v50, %v396_v49 }
 0x166   :  { %v1033_v53 = vpop.eup %1032  ;;  %v425_v57 = vadd.f32 1.0, %v1031_v48  ;;  %v430_v6 = vmul.f32 %v422_v55, %v398_v54 }
 0x167   :  { %v1035_v58 = vpop.eup %1034  ;;  %v431_v60 = vmul.f32 %v423_v52, %v399_v51  ;;  %v424_v62 = vadd.f32 1.0, %v1033_v53 }
 0x168   :  { %v433_v0 = vmul.f32 %v425_v57, %v401_v56  ;;  %v426_v2 = vadd.f32 1.0, %v1035_v58 }
 0x169   :  { %v437_v4 = vpack.c.bf16 %v431_v60, %v427_v59  ;;  %v432_v5 = vmul.f32 %v424_v62, %v400_v61 }
 0x16a   :  { %v439_v7 = vpack.c.bf16 %v433_v0, %v429_v63  ;;  %v434_v8 = vmul.f32 %v426_v2, %v402_v1 }
 0x16b   :  { %v438_v9 = vpack.c.bf16 %v432_v5, %v428_v3 }
 0x16c   :  { %v440_v10 = vpack.c.bf16 %v434_v8, %v430_v6 }
 0x16d   :  { %729 = vmatprep.mubr.bf16.mxu0 %v438_v9 }
 0x16e   :  { %770 = vmatprep.mubr.bf16.mxu1 %v440_v10  ;;  %730 = vmatmul.mubr.bf16.vlgmr.msra.gmra.mrb[4].mxu0 %v437_v4 }
 0x16f   :  { %771 = vmatmul.mubr.bf16.vlgmr.msra.gmra.mrb[4].mxu1 %v439_v7 }
 0x241   :  { %v899_v11 = vpop.f32.mrb[4].mxu0 }
 0x242   :  { %v921_v12 = vpop.f32.mrb[4].mxu1  ;;  %v900_v13 = vpop.f32.mrb[5].mxu0 }
 0x243   :  { %v901_v14 = vadd.f32 %v900_v13, %v899_v11  ;;  %v922_v15 = vpop.f32.mrb[5].mxu1  ;;  %v902_v16 = vpop.f32.mrb[6].mxu0 }
 0x244   :  { %v923_v17 = vadd.f32 %v922_v15, %v921_v12  ;;  %v924_v18 = vpop.f32.mrb[6].mxu1  ;;  %v903_v19 = vpop.f32.mrb[7].mxu0 }
 0x245   :  { %v904_v21 = vadd.f32 %v903_v19, %v902_v16  ;;  %v925_v22 = vpop.f32.mrb[7].mxu1 }
 0x246   :  { %v773_v23 = vadd.f32 %v923_v17, %v901_v14  ;;  %v926_v24 = vadd.f32 %v925_v22, %v924_v18 }
 0x248   :  { %v795_v25 = vadd.f32 %v882_v20, %v773_v23  ;;  %v776_v26 = vadd.f32 %v926_v24, %v904_v21 }
 0x24a   :  { %797 = vst [vmem:[#allocation12] sm:$0xff] %v795_v25  ;;  %v796_v27 = vadd.f32 %v882_v20, %v776_v26 }
 0x24c   :  { %798 = vst [vmem:[#allocation12 + $0x8] sm:$0xff] %v796_v27 }
 0x24d   :  { %1157 = shalt.err (!%p1154_p2)
}
 0x24e   :  { %s1158_s10 = scalar_lea.hbm %s1302_s5, 256 }
 0x24f   :  { %p1159_p3 = scmp.ne.s32.totalorder %s1302_s5, %s1158_s10  ;;  %p1162_p4 = scmp.lt.u32.totalorder %s1158_s10, %s1302_s5 }
 0x251   :  { %p1164_p5 = pnand %p1162_p4, %p1159_p3 }
 0x253   :  { %1167 = shalt.err (!%p1164_p5)
}
 0x254   :  { %810 = dma.vmem_to_hbm [thread:$0]  %s805_s6, 256, %s1302_s5, [#allocation5], %s1183_s3, %s1183_s3, %s1184_s30  }
 0x255   :  { %1174 = dma.done.wait [#allocation5], 256  }
 0x256   :  { %1175 = vsyncadd [#allocation5], 4294967040 }
 0x257   :  { %814 = vsyncpa [#allocation4], 1 }
 0x258   :  { %815 = vsyncpa [#allocation7], 1 }
 0x259   :  { %816 = vsyncpa [#allocation10], 1 }
 0x25a   :  { %817 = vsyncpa [#allocation5], 1 }

</bundles_post_ra>
